<compile_context>
chip_gen: v5e
topology: v5e:2x2
jax: 0.10.0
libtpu: 0.0.40
codegen_flags: <defaults>
</compile_context>

<pallas_src>
import math

import jax
import jax.numpy as jnp
from jax.experimental import pallas as pl
from jax.experimental.pallas import tpu as pltpu

LEAKY_SLOPE = 0.01  # torch.nn.LeakyReLU default negative_slope


def _leaky_relu(x):
    return jnp.where(x >= 0, x, LEAKY_SLOPE * x)


def critic_kernel(
    x_ref,                          # [A+S, blk]  packed (action; state), batch on lanes
    w1_ref, b1_ref,                 # [L1, A+S], [L1, 1]   (w1 columns in packed order)
    w2h_ref, w2a_ref, b2_ref,       # [L2, L1], [L2, A], [L2, 1]
    w3h_ref, w3a_ref, w3abs_ref,    # [L2, 1], [A, 1], [A, 1]
    b3_ref,                         # (1,) in SMEM
    out_ref,                        # [1, blk]
):
    f32 = jnp.float32
    x = x_ref[...]                                   # [A+S, blk]
    A = w2a_ref.shape[1]
    a = x[:A, :]                                     # [A, blk] (prefix sublane slice)

    # Layer 1: Linear(cat(state, action)) == one dot on the whole packed input.
    h1 = jnp.dot(w1_ref[...], x, preferred_element_type=f32) + b1_ref[...]
    h1 = _leaky_relu(h1)                             # [L1, blk] f32

    # Layer 2: Linear(cat(h1, action)) as two split matmuls.
    h2 = (
        jnp.dot(w2h_ref[...], h1.astype(w2h_ref.dtype), preferred_element_type=f32)
        + jnp.dot(w2a_ref[...], a, preferred_element_type=f32)
        + b2_ref[...]
    )
    h2 = _leaky_relu(h2)                             # [L2, blk] f32

    # Layer 3: Linear(cat(h2, action, |action|)) -> scalar per column.
    # Single output row: VPU broadcast-mul + sublane reduce instead of an
    # M=1 MXU matmul.
    a32 = a.astype(f32)
    out = (
        jnp.sum(h2 * w3h_ref[...], axis=0, keepdims=True)
        + jnp.sum(a32 * w3a_ref[...], axis=0, keepdims=True)
        + jnp.sum(jnp.abs(a32) * w3abs_ref[...], axis=0, keepdims=True)
        + b3_ref[0]
    )                                                # [1, blk]
    out_ref[...] = out.astype(out_ref.dtype)


def critic_forward(state, action, params, *, block_cols=16384,
                   compute_dtype=jnp.bfloat16):
    """state: [B, S], action: [B, A] -> [B, 1] (f32)."""
    B, S = state.shape
    A = action.shape[1]
    cd = compute_dtype

    # Pack + transpose so batch is on the lane axis (dense DMA in, dense store out).
    x_t = jnp.concatenate([action, state], axis=1).T.astype(cd)   # [A+S, B]

    w1 = params["w1"].astype(cd)
    w2h = params["w2h"].astype(cd)
    w2a = params["w2a"].astype(cd)
    b1, b2 = params["b1"], params["b2"]                 # stay f32
    w3h, w3a, w3abs = params["w3h"], params["w3a"], params["w3abs"]
    b3 = params["b3"]                                   # (1,) f32 -> SMEM

    # Batch tile: big (amortize per-step overhead), multiple of 128 lanes,
    # capped at ~B/2 so there are >= 2 grid steps for megacore chips.
    block_cols = max(128, (block_cols // 128) * 128)
    if B <= 256:
        blk = B                                         # full-extent block (allowed)
    else:
        half = ((pl.cdiv(B, 2) + 127) // 128) * 128
        blk = max(128, min(block_cols, half))
    grid = (pl.cdiv(B, blk),)                           # ragged last block, no jnp.pad

    def resident(arr):
        return pl.BlockSpec(arr.shape, lambda i: (0, 0))

    out = pl.pallas_call(
        critic_kernel,
        out_shape=jax.ShapeDtypeStruct((1, B), jnp.float32),
        grid=grid,
        in_specs=[
            pl.BlockSpec((A + S, blk), lambda i: (0, i)),   # streamed packed activations
            resident(w1), resident(b1),
            resident(w2h), resident(w2a), resident(b2),
            resident(w3h), resident(w3a), resident(w3abs),
            pl.BlockSpec(memory_space=pltpu.MemorySpace.SMEM),  # b3 scalar
        ],
        out_specs=pl.BlockSpec((1, blk), lambda i: (0, i)),
        compiler_params=pltpu.CompilerParams(
            dimension_semantics=("parallel",),
            vmem_limit_bytes=32 * 1024 * 1024,
        ),
    )(x_t, w1, b1, w2h, w2a, b2, w3h, w3a, w3abs, b3)

    return out.reshape(B, 1)


def init_params(key, state_dim, action_dims, layer1_dims, layer2_dims):
    """Init matching torch.nn.Linear default (uniform +/- 1/sqrt(fan_in)).

    Weights stay in PyTorch (out, in) layout since the kernel computes
    transposed (h_t = W @ x_t).  Layer-1 columns are reordered to the packed
    (action, state) order; layers 2/3 are split along their input axis.
    """
    def linear(key, fan_in, fan_out):
        kw, kb = jax.random.split(key)
        bound = 1.0 / math.sqrt(fan_in)
        w = jax.random.uniform(kw, (fan_out, fan_in), jnp.float32, -bound, bound)
        b = jax.random.uniform(kb, (fan_out,), jnp.float32, -bound, bound)
        return w, b

    S, A, L1, L2 = state_dim, action_dims, layer1_dims, layer2_dims
    k1, k2, k3 = jax.random.split(key, 3)
    w1, b1 = linear(k1, S + A, L1)            # PyTorch cat order: (state, action)
    w2, b2 = linear(k2, L1 + A, L2)           # (h1, action)
    w3, b3 = linear(k3, L2 + 2 * A, 1)        # (h2, action, |action|)

    return {
        # columns reordered to the packed (action, state) input order:
        "w1": jnp.concatenate([w1[:, S:], w1[:, :S]], axis=1),   # [L1, A+S]
        "b1": b1[:, None],                                       # [L1, 1]
        "w2h": w2[:, :L1],                                       # [L2, L1]
        "w2a": w2[:, L1:],                                       # [L2, A]
        "b2": b2[:, None],                                       # [L2, 1]
        "w3h": w3[0, :L2][:, None],                              # [L2, 1]
        "w3a": w3[0, L2:L2 + A][:, None],                        # [A, 1]
        "w3abs": w3[0, L2 + A:][:, None],                        # [A, 1]
        "b3": b3,                                                # (1,)
    }


def critic_reference(state, action, params):
    """Pure-JAX reference mirroring the PyTorch forward (packed order == concat)."""
    x = jnp.concatenate([action, state], axis=1)        # matches packed w1 columns
    h1 = x @ params["w1"].T + params["b1"][:, 0]
    h1 = jnp.where(h1 >= 0, h1, LEAKY_SLOPE * h1)
    h2 = h1 @ params["w2h"].T + action @ params["w2a"].T + params["b2"][:, 0]
    h2 = jnp.where(h2 >= 0, h2, LEAKY_SLOPE * h2)
    out = (h2 @ params["w3h"] + action @ params["w3a"]
           + jnp.abs(action) @ params["w3abs"] + params["b3"])
    return out


if __name__ == "__main__":
    state_dim, action_dims = 12, 4
    layer1_dims, layer2_dims = 32, 32

    key = jax.random.PRNGKey(0)
    k_params, k_state, k_action = jax.random.split(key, 3)
    params = init_params(k_params, state_dim, action_dims, layer1_dims, layer2_dims)

    # 1) Small batch, f32 path, strict tolerance.
    batch = 2
    state = jax.random.normal(k_state, (batch, state_dim), jnp.float32)
    action = jax.random.normal(k_action, (batch, action_dims), jnp.float32)
    out = jax.block_until_ready(
        critic_forward(state, action, params, compute_dtype=jnp.float32))
    ref = critic_reference(state, action, params)
    assert out.shape == (batch, 1), out.shape
    assert jnp.allclose(out, ref, atol=1e-4, rtol=1e-4), (out, ref)

    # 2) Multi-tile case with a ragged final block (no host padding), f32.
    batch2 = 300
    state2 = jax.random.normal(k_state, (batch2, state_dim), jnp.float32)
    action2 = jax.random.normal(k_action, (batch2, action_dims), jnp.float32)
    out2 = jax.block_until_ready(
        critic_forward(state2, action2, params, block_cols=128,
                       compute_dtype=jnp.float32))
    ref2 = critic_reference(state2, action2, params)
    assert out2.shape == (batch2, 1), out2.shape
    assert jnp.allclose(out2, ref2, atol=1e-4, rtol=1e-4)

    # 3) Default bf16 streamed path (f32 accumulation), bigger batch, loose tol.
    batch3 = 1000
    state3 = jax.random.normal(k_state, (batch3, state_dim), jnp.float32)
    action3 = jax.random.normal(k_action, (batch3, action_dims), jnp.float32)
    out3 = jax.block_until_ready(critic_forward(state3, action3, params))
    ref3 = critic_reference(state3, action3, params)
    assert out3.shape == (batch3, 1), out3.shape
    assert jnp.allclose(out3, ref3, atol=5e-2, rtol=5e-2)

    print("KERNEL_OK")
</pallas_src>

<mosaic_0001>
module attributes {stable_mosaic.version = 11 : i64} {
  func.func @critic_kernel(%arg0: i32, %arg1: memref<16x2xf32, #tpu.memory_space<vmem>>, %arg2: memref<32x16xf32, #tpu.memory_space<vmem>>, %arg3: memref<32x1xf32, #tpu.memory_space<vmem>>, %arg4: memref<32x32xf32, #tpu.memory_space<vmem>>, %arg5: memref<32x4xf32, #tpu.memory_space<vmem>>, %arg6: memref<32x1xf32, #tpu.memory_space<vmem>>, %arg7: memref<32x1xf32, #tpu.memory_space<vmem>>, %arg8: memref<4x1xf32, #tpu.memory_space<vmem>>, %arg9: memref<4x1xf32, #tpu.memory_space<vmem>>, %arg10: memref<1xf32, #tpu.memory_space<smem>>, %arg11: memref<1x2xf32, #tpu.memory_space<vmem>>) attributes {dimension_semantics = [#tpu.dimension_semantics<parallel>], iteration_bounds = array<i64: 1>, scalar_prefetch = 0 : i64, scratch_operands = 0 : i64, tpu.core_type = #tpu.core_type<tc>, window_params = [{transform_indices = @transform_0, window_bounds = array<i64: 16, 2>}, {pipeline_mode = #tpu.pipeline_mode<synchronous>, transform_indices = @transform_1, window_bounds = array<i64: 32, 16>}, {pipeline_mode = #tpu.pipeline_mode<synchronous>, transform_indices = @transform_2, window_bounds = array<i64: 32, 1>}, {pipeline_mode = #tpu.pipeline_mode<synchronous>, transform_indices = @transform_3, window_bounds = array<i64: 32, 32>}, {pipeline_mode = #tpu.pipeline_mode<synchronous>, transform_indices = @transform_4, window_bounds = array<i64: 32, 4>}, {pipeline_mode = #tpu.pipeline_mode<synchronous>, transform_indices = @transform_5, window_bounds = array<i64: 32, 1>}, {pipeline_mode = #tpu.pipeline_mode<synchronous>, transform_indices = @transform_6, window_bounds = array<i64: 32, 1>}, {pipeline_mode = #tpu.pipeline_mode<synchronous>, transform_indices = @transform_7, window_bounds = array<i64: 4, 1>}, {pipeline_mode = #tpu.pipeline_mode<synchronous>, transform_indices = @transform_8, window_bounds = array<i64: 4, 1>}, {transform_indices = @transform_9, window_bounds = array<i64: 1>}, {transform_indices = @transform_10, window_bounds = array<i64: 1, 2>}]} {
    %c0 = arith.constant 0 : index
    %c0_0 = arith.constant 0 : index
    %0 = vector.load %arg1[%c0, %c0_0] : memref<16x2xf32, #tpu.memory_space<vmem>>, vector<16x2xf32>
    %1 = vector.extract_strided_slice %0 {offsets = [0, 0], sizes = [4, 2], strides = [1, 1]} : vector<16x2xf32> to vector<4x2xf32>
    %c0_1 = arith.constant 0 : index
    %c0_2 = arith.constant 0 : index
    %2 = vector.load %arg2[%c0_1, %c0_2] : memref<32x16xf32, #tpu.memory_space<vmem>>, vector<32x16xf32>
    %cst = arith.constant dense<0.000000e+00> : vector<32x2xf32>
    %3 = tpu.matmul %2, %0, %cst {dimension_numbers = #tpu.dot_dimension_numbers<[1], [0], [0], [1], [0, 0, 1, 1], [], []>} : vector<32x16xf32>, vector<16x2xf32>, vector<32x2xf32> -> vector<32x2xf32>
    %c0_3 = arith.constant 0 : index
    %c0_4 = arith.constant 0 : index
    %4 = vector.load %arg3[%c0_3, %c0_4] : memref<32x1xf32, #tpu.memory_space<vmem>>, vector<32x1xf32>
    %5 = vector.broadcast %4 : vector<32x1xf32> to vector<32x2xf32>
    %6 = arith.addf %3, %5 : vector<32x2xf32>
    %cst_5 = arith.constant 0.000000e+00 : f32
    %7 = vector.broadcast %cst_5 : f32 to vector<32x2xf32>
    %8 = arith.cmpf oge, %6, %7 : vector<32x2xf32>
    %cst_6 = arith.constant 0.00999999977 : f32
    %9 = vector.broadcast %cst_6 : f32 to vector<32x2xf32>
    %10 = arith.mulf %9, %6 : vector<32x2xf32>
    %11 = arith.select %8, %6, %10 : vector<32x2xi1>, vector<32x2xf32>
    %c0_7 = arith.constant 0 : index
    %c0_8 = arith.constant 0 : index
    %12 = vector.load %arg4[%c0_7, %c0_8] : memref<32x32xf32, #tpu.memory_space<vmem>>, vector<32x32xf32>
    %cst_9 = arith.constant dense<0.000000e+00> : vector<32x2xf32>
    %13 = tpu.matmul %12, %11, %cst_9 {dimension_numbers = #tpu.dot_dimension_numbers<[1], [0], [0], [1], [0, 0, 1, 1], [], []>} : vector<32x32xf32>, vector<32x2xf32>, vector<32x2xf32> -> vector<32x2xf32>
    %c0_10 = arith.constant 0 : index
    %c0_11 = arith.constant 0 : index
    %14 = vector.load %arg5[%c0_10, %c0_11] : memref<32x4xf32, #tpu.memory_space<vmem>>, vector<32x4xf32>
    %cst_12 = arith.constant dense<0.000000e+00> : vector<32x2xf32>
    %15 = tpu.matmul %14, %1, %cst_12 {dimension_numbers = #tpu.dot_dimension_numbers<[1], [0], [0], [1], [0, 0, 1, 1], [], []>} : vector<32x4xf32>, vector<4x2xf32>, vector<32x2xf32> -> vector<32x2xf32>
    %16 = arith.addf %13, %15 : vector<32x2xf32>
    %c0_13 = arith.constant 0 : index
    %c0_14 = arith.constant 0 : index
    %17 = vector.load %arg6[%c0_13, %c0_14] : memref<32x1xf32, #tpu.memory_space<vmem>>, vector<32x1xf32>
    %18 = vector.broadcast %17 : vector<32x1xf32> to vector<32x2xf32>
    %19 = arith.addf %16, %18 : vector<32x2xf32>
    %cst_15 = arith.constant 0.000000e+00 : f32
    %20 = vector.broadcast %cst_15 : f32 to vector<32x2xf32>
    %21 = arith.cmpf oge, %19, %20 : vector<32x2xf32>
    %cst_16 = arith.constant 0.00999999977 : f32
    %22 = vector.broadcast %cst_16 : f32 to vector<32x2xf32>
    %23 = arith.mulf %22, %19 : vector<32x2xf32>
    %24 = arith.select %21, %19, %23 : vector<32x2xi1>, vector<32x2xf32>
    %c0_17 = arith.constant 0 : index
    %c0_18 = arith.constant 0 : index
    %25 = vector.load %arg7[%c0_17, %c0_18] : memref<32x1xf32, #tpu.memory_space<vmem>>, vector<32x1xf32>
    %26 = vector.broadcast %25 : vector<32x1xf32> to vector<32x2xf32>
    %27 = arith.mulf %24, %26 : vector<32x2xf32>
    %cst_19 = arith.constant dense<0.000000e+00> : vector<2xf32>
    %28 = vector.multi_reduction <add>, %27, %cst_19 [0] : vector<32x2xf32> to vector<2xf32>
    %29 = vector.shape_cast %28 : vector<2xf32> to vector<1x2xf32>
    %c0_20 = arith.constant 0 : index
    %c0_21 = arith.constant 0 : index
    %30 = vector.load %arg8[%c0_20, %c0_21] : memref<4x1xf32, #tpu.memory_space<vmem>>, vector<4x1xf32>
    %31 = vector.broadcast %30 : vector<4x1xf32> to vector<4x2xf32>
    %32 = arith.mulf %1, %31 : vector<4x2xf32>
    %cst_22 = arith.constant dense<0.000000e+00> : vector<2xf32>
    %33 = vector.multi_reduction <add>, %32, %cst_22 [0] : vector<4x2xf32> to vector<2xf32>
    %34 = vector.shape_cast %33 : vector<2xf32> to vector<1x2xf32>
    %35 = arith.addf %29, %34 : vector<1x2xf32>
    %36 = math.absf %1 : vector<4x2xf32>
    %c0_23 = arith.constant 0 : index
    %c0_24 = arith.constant 0 : index
    %37 = vector.load %arg9[%c0_23, %c0_24] : memref<4x1xf32, #tpu.memory_space<vmem>>, vector<4x1xf32>
    %38 = vector.broadcast %37 : vector<4x1xf32> to vector<4x2xf32>
    %39 = arith.mulf %36, %38 : vector<4x2xf32>
    %cst_25 = arith.constant dense<0.000000e+00> : vector<2xf32>
    %40 = vector.multi_reduction <add>, %39, %cst_25 [0] : vector<4x2xf32> to vector<2xf32>
    %41 = vector.shape_cast %40 : vector<2xf32> to vector<1x2xf32>
    %42 = arith.addf %35, %41 : vector<1x2xf32>
    %c0_26 = arith.constant 0 : index
    %43 = memref.load %arg10[%c0_26] : memref<1xf32, #tpu.memory_space<smem>>
    %44 = vector.broadcast %43 : f32 to vector<1x2xf32>
    %45 = arith.addf %42, %44 : vector<1x2xf32>
    %c0_27 = arith.constant 0 : index
    %c0_28 = arith.constant 0 : index
    %46 = vector.load %arg11[%c0_27, %c0_28] : memref<1x2xf32, #tpu.memory_space<vmem>>, vector<1x2xf32>
    tpu.vector_store %arg11[%c0_27, %c0_28], %45 {strides = array<i32>} : memref<1x2xf32, #tpu.memory_space<vmem>>, vector<1x2xf32>,
    return
  }
  func.func @transform_0(%arg0: i32) -> (i32, i32) {
    %c0_i32 = arith.constant 0 : i32
    %c0_i32_0 = arith.constant 0 : i32
    return %c0_i32, %arg0 : i32, i32
  }
  func.func @transform_1(%arg0: i32) -> (i32, i32) {
    %c0_i32 = arith.constant 0 : i32
    %c0_i32_0 = arith.constant 0 : i32
    %c0_i32_1 = arith.constant 0 : i32
    return %c0_i32, %c0_i32_0 : i32, i32
  }
  func.func @transform_2(%arg0: i32) -> (i32, i32) {
    %c0_i32 = arith.constant 0 : i32
    %c0_i32_0 = arith.constant 0 : i32
    %c0_i32_1 = arith.constant 0 : i32
    return %c0_i32, %c0_i32_0 : i32, i32
  }
  func.func @transform_3(%arg0: i32) -> (i32, i32) {
    %c0_i32 = arith.constant 0 : i32
    %c0_i32_0 = arith.constant 0 : i32
    %c0_i32_1 = arith.constant 0 : i32
    return %c0_i32, %c0_i32_0 : i32, i32
  }
  func.func @transform_4(%arg0: i32) -> (i32, i32) {
    %c0_i32 = arith.constant 0 : i32
    %c0_i32_0 = arith.constant 0 : i32
    %c0_i32_1 = arith.constant 0 : i32
    return %c0_i32, %c0_i32_0 : i32, i32
  }
  func.func @transform_5(%arg0: i32) -> (i32, i32) {
    %c0_i32 = arith.constant 0 : i32
    %c0_i32_0 = arith.constant 0 : i32
    %c0_i32_1 = arith.constant 0 : i32
    return %c0_i32, %c0_i32_0 : i32, i32
  }
  func.func @transform_6(%arg0: i32) -> (i32, i32) {
    %c0_i32 = arith.constant 0 : i32
    %c0_i32_0 = arith.constant 0 : i32
    %c0_i32_1 = arith.constant 0 : i32
    return %c0_i32, %c0_i32_0 : i32, i32
  }
  func.func @transform_7(%arg0: i32) -> (i32, i32) {
    %c0_i32 = arith.constant 0 : i32
    %c0_i32_0 = arith.constant 0 : i32
    %c0_i32_1 = arith.constant 0 : i32
    return %c0_i32, %c0_i32_0 : i32, i32
  }
  func.func @transform_8(%arg0: i32) -> (i32, i32) {
    %c0_i32 = arith.constant 0 : i32
    %c0_i32_0 = arith.constant 0 : i32
    %c0_i32_1 = arith.constant 0 : i32
    return %c0_i32, %c0_i32_0 : i32, i32
  }
  func.func @transform_9(%arg0: i32) -> i32 {
    %c0_i32 = arith.constant 0 : i32
    %c0_i32_0 = arith.constant 0 : i32
    return %c0_i32 : i32
  }
  func.func @transform_10(%arg0: i32) -> (i32, i32) {
    %c0_i32 = arith.constant 0 : i32
    %c0_i32_0 = arith.constant 0 : i32
    return %c0_i32, %arg0 : i32, i32
  }
}

</mosaic_0001>

<bundles_post_ra>
// kernel: tpu_custom_call.1
= control target key start
LH: loop header
LB: loop body
LE: loop exit
PB: predicated region body
PF: predicated region fallthrough
CT: control target
= control target key end

     0   :  { %v402_v3 = vmov 0   ;;  %vm67_vm0 = vcmask 130048   ;;  %s570_s0 = inlined_call_operand.vmem [shape: f32[16,2], index: 0, kind: input, shape index: {}]   ;;  %s571_s1 = inlined_call_operand.vmem [shape: f32[32,16], index: 1, kind: input, shape index: {}]   ;;  %s572_s2 = inlined_call_operand.vmem [shape: f32[32,1], index: 2, kind: input, shape index: {}]   ;;  %s573_s3 = inlined_call_operand.vmem [shape: f32[32,32], index: 3, kind: input, shape index: {}]   ;;  %s574_s4 = inlined_call_operand.vmem [shape: f32[32,4], index: 4, kind: input, shape index: {}]   ;;  %s575_s5 = inlined_call_operand.vmem [shape: f32[32,1], index: 5, kind: input, shape index: {}]   ;;  %s576_s6 = inlined_call_operand.vmem [shape: f32[32,1], index: 6, kind: input, shape index: {}]   ;;  %s577_s7 = inlined_call_operand.vmem [shape: f32[4,1], index: 7, kind: input, shape index: {}]   ;;  %s578_s8 = inlined_call_operand.vmem [shape: f32[4,1], index: 8, kind: input, shape index: {}]   ;;  %s579_s9 = inlined_call_operand.<no memory space> [shape: f32[1], index: 9, kind: input, shape index: {}]   ;;  %s580_s10 = inlined_call_operand.hbm [shape: f32[1,2], index: 10, kind: output, shape index: {}]  }
   0x1   :  { %v38_v0 = vld [vmem:[%s570_s0 + $0x8] sm:$0xff]  ;;  %v46_v1 = vld [vmem:[%s572_s2 + $0x18] sm:$0xff]  ;;  %374 = vset.pattern.permute.xlu1 %v402_v3  ;;  %373 = vset.pattern.permute.xlu0 %v402_v3  ;;  %v471_v4 = vld [vmem:[%s570_s0] sm:$0xff] }
   0x2   :  { %v44_v2 = vld [vmem:[%s572_s2 + $0x8] sm:$0xff]  ;;  %94 = vmatpush.msra.mxu0 %v38_v0  ;;  %365 = vmatpush.msra.mxu2 %v38_v0  ;;  %v39_v5 = vld [vmem:[%s571_s1] sm:$0xff]  ;;  %v42_v6 = vld [vmem:[%s571_s1 + $0x18] sm:$0xff] }
   0x3   :  { %64 = vperm.xlu0 %373, %v46_v1   ;;  %54 = vperm.xlu1 %374, %v44_v2  }
   0x4   :  { %95 = vmatpush.msra.mxu0 %v471_v4  ;;  %366 = vmatpush.msra.mxu2 %v471_v4 }
   0x5   :  { %352 = vmatmul.msk.f32.vlgmr.msra.gmra.mxu0 %vm67_vm0, %v39_v5  ;;  %355 = vmatmul.msk.f32.vlgmr.msra.gmra.mxu2 %vm67_vm0, %v42_v6 }
   0x6   :  { %16 = vsyncpa [#allocation4], 0  ;;  %375 = vset.pattern.permute.xlu2 %v402_v3  ;;  %v45_v7 = vld [vmem:[%s572_s2 + $0x10] sm:$0xff]  ;;  %v43_v8 = vld [vmem:[%s572_s2] sm:$0xff]  ;;  %vm142_vm1 = vcmask 1043456   ;;  %vm129_vm2 = vcmask 31744  }
   0x7   :  { %v40_v9 = vld [vmem:[%s571_s1 + $0x8] sm:$0xff]  ;;  %v219_v10 = vld [vmem:[%s575_s5 + $0x10] sm:$0xff]  ;;  %v220_v11 = vld [vmem:[%s575_s5 + $0x18] sm:$0xff]  ;;  %356 = vmatpush.msk.msra.mxu1 %vm142_vm1, %v471_v4  ;;  %vm175_vm7 = vcmask 261120   ;;  %v315_v6 = vand.u32 2147483647, %v471_v4 }
   0x8   :  { %v41_v12 = vld [vmem:[%s571_s1 + $0x10] sm:$0xff]  ;;  %v258_v13 = vld [vmem:[%s576_s6 + $0x8] sm:$0xff]  ;;  %v299_v15 = vld [vmem:[%s577_s7] sm:$0xf]  ;;  %vm306_vm10 = vcmask 11264   ;;  %vm285_vm12 = vcmask 15360  }
   0x9   :  { %v259_v14 = vld [vmem:[%s576_s6 + $0x10] sm:$0xff]  ;;  %v316_v16 = vld [vmem:[%s578_s8] sm:$0xf]  ;;  %v126_v19 = vld [vmem:[%s574_s4 + $0x8] sm:$0xff]  ;;  %s403_s20 = smov [#allocation3]   ;;  %s343_s23 = sshll.u32 %s580_s10, 4  ;;  %s344_s23 = int_to_ptr.hbm [resolvable:$true] %s343_s23 }
   0xa   :  { %v125_v17 = vld [vmem:[%s574_s4] sm:$0xff]  ;;  %v127_v24 = vld [vmem:[%s574_s4 + $0x10] sm:$0xff]  ;;  %v218_v29 = vld [vmem:[%s575_s5 + $0x8] sm:$0xff]  ;;  %s341_s21 = sshll.u32 %s403_s20, 4  ;;  %vm334_vm14 = vcmask 8192   ;;  %s342_s21 = int_to_ptr.vmem [resolvable:$true] %s341_s21 }
   0xb   :  { %59 = vperm.xlu0 %373, %v45_v7   ;;  %49 = vperm.xlu1 %374, %v43_v8   ;;  %v217_v20 = vld [vmem:[%s575_s5] sm:$0xff]  ;;  %v128_v30 = vld [vmem:[%s574_s4 + $0x18] sm:$0xff]  ;;  %v122_v44 = vld [vmem:[%s573_s3 + $0x8] sm:$0xff] }
   0xc   :  { %357 = vmatmul.msk.f32.vlgmr.msra.gmra.mxu1 %vm129_vm2, %v125_v17  ;;  %223 = vperm.xlu2 %375, %v217_v20   ;;  %v257_v37 = vld [vmem:[%s576_s6] sm:$0xff]  ;;  %v260_v46 = vld [vmem:[%s576_s6 + $0x18] sm:$0xff]  ;;  %v123_v47 = vld [vmem:[%s573_s3 + $0x10] sm:$0xff] }
   0xd   :  { %353 = vmatmul.msk.f32.gmra.mxu0 %vm67_vm0, %v40_v9  ;;  %v121_v43 = vld [vmem:[%s573_s3] sm:$0xff]  ;;  %v124_v48 = vld [vmem:[%s573_s3 + $0x18] sm:$0xff] }
  0x13   :  { %233 = vperm.xlu0 %373, %v219_v10   ;;  %238 = vperm.xlu1 %374, %v220_v11  }
  0x14   :  { %358 = vmatmul.msk.f32.gmra.mxu1 %vm129_vm2, %v126_v19  ;;  %228 = vperm.xlu2 %375, %v218_v29  }
  0x15   :  { %354 = vmatmul.msk.f32.gmra.mxu0 %vm67_vm0, %v41_v12 }
  0x1b   :  { %268 = vperm.xlu0 %373, %v258_v13   ;;  %273 = vperm.xlu1 %374, %v259_v14  }
  0x1c   :  { %359 = vmatmul.msk.f32.gmra.mxu1 %vm129_vm2, %v127_v24  ;;  %263 = vperm.xlu2 %375, %v257_v37  }
  0x23   :  { %302 = vperm.xlu0 %373, %v299_v15   ;;  %319 = vperm.xlu1 %374, %v316_v16  }
  0x24   :  { %360 = vmatmul.msk.f32.gmra.mxu1 %vm129_vm2, %v128_v30  ;;  %278 = vperm.xlu2 %375, %v260_v46  }
  0x66   :  { %v224_v52 = vpop.permute.xlu2 %223 }
  0x6e   :  { %v229_v60 = vpop.permute.xlu2 %228 }
  0x75   :  { %v65_v21 = vpop.permute.xlu0 %64  ;;  %v55_v22 = vpop.permute.xlu1 %54 }
  0x76   :  { %v264_v10 = vpop.permute.xlu2 %263 }
  0x7d   :  { %v60_v31 = vpop.permute.xlu0 %59  ;;  %v50_v33 = vpop.permute.xlu1 %49 }
  0x82   :  { %v97_v18 = vpop.f32.mrf.mxu0 }
  0x83   :  { %v98_v35 = vadd.f32 %v97_v18, %v50_v33 }
  0x85   :  { %v113_v41 = vmul.f32 0.01, %v98_v35  ;;  %vm109_vm6 = vcmp.ge.f32.partialorder %v98_v35, 0.0  ;;  %v234_v50 = vpop.permute.xlu0 %233  ;;  %v239_v51 = vpop.permute.xlu1 %238 }
  0x87   :  { %v117_v45 = vsel %vm109_vm6, %v98_v35, %v113_v41 }
  0x88   :  { %v106_v23 = vpop.f32.mrf.mxu2 }
  0x89   :  { %v107_v25 = vadd.f32 %v106_v23, %v65_v21  ;;  %v163_v49 = vpop.f32.mrf.mxu1 }
  0x8a   :  { %v100_v26 = vpop.f32.mrf.mxu0 }
  0x8b   :  { %vm112_vm3 = vcmp.ge.f32.partialorder %v107_v25, 0.0  ;;  %v116_v27 = vmul.f32 0.01, %v107_v25  ;;  %v101_v32 = vadd.f32 %v100_v26, %v55_v22 }
  0x8d   :  { %v120_v28 = vsel %vm112_vm3, %v107_v25, %v116_v27  ;;  %v114_v39 = vmul.f32 0.01, %v101_v32  ;;  %vm110_vm5 = vcmp.ge.f32.partialorder %v101_v32, 0.0  ;;  %v269_v54 = vpop.permute.xlu0 %268  ;;  %v274_v57 = vpop.permute.xlu1 %273 }
  0x8e   :  { %200 = vmatpush.msrb.mxu2 %v120_v28  ;;  %367 = vmatpush.msra.mxu3 %v120_v28 }
  0x8f   :  { %v118_v42 = vsel %vm110_vm5, %v101_v32, %v114_v39 }
  0x91   :  { %v166_v53 = vpop.f32.mrf.mxu1 }
  0x92   :  { %v103_v34 = vpop.f32.mrf.mxu0 }
  0x93   :  { %v104_v36 = vadd.f32 %v103_v34, %v60_v31  ;;  %v279_v31 = vpop.permute.xlu2 %278 }
  0x95   :  { %vm111_vm4 = vcmp.ge.f32.partialorder %v104_v36, 0.0  ;;  %v115_v38 = vmul.f32 0.01, %v104_v36  ;;  %v303_v1 = vpop.permute.xlu0 %302  ;;  %v320_v7 = vpop.permute.xlu1 %319 }
  0x96   :  { %v305_v9 = vmul.f32 %v303_v1, %v471_v4  ;;  %v322_v14 = vmul.f32 %v320_v7, %v315_v6 }
  0x97   :  { %v119_v40 = vsel %vm111_vm4, %v104_v36, %v115_v38 }
  0x98   :  { %201 = vmatpush.msrb.mxu2 %v119_v40  ;;  %368 = vmatpush.msra.mxu3 %v119_v40  ;;  %v307_v17 = vsel %vm306_vm10, %v305_v9, 0.0  ;;  %v323_v22 = vsel %vm306_vm10, %v322_v14, 0.0 }
  0x99   :  { %v169_v61 = vpop.f32.mrf.mxu1  ;;  %v308_v24 = vrot.slane %v307_v17, 4  ;;  %v324_v27 = vrot.slane %v323_v22, 4 }
  0x9a   :  { %202 = vmatpush.msrb.mxu2 %v118_v42  ;;  %369 = vmatpush.msra.mxu3 %v118_v42 }
  0x9b   :  { %v309_v30 = vadd.f32 %v308_v24, %v307_v17  ;;  %v325_v35 = vadd.f32 %v324_v27, %v323_v22 }
  0x9c   :  { %203 = vmatpush.msrb.mxu2 %v117_v45  ;;  %370 = vmatpush.msra.mxu3 %v117_v45 }
  0x9d   :  { %361 = vmatmul.msk.f32.vlgmr.msrb.gmra.mxu2 %vm175_vm7, %v121_v43  ;;  %362 = vmatmul.msk.f32.vlgmr.msra.gmra.mxu3 %vm175_vm7, %v122_v44  ;;  %v310_v38 = vrot.slane %v309_v30, 2  ;;  %v326_v40 = vrot.slane %v325_v35, 2 }
  0x9f   :  { %v311_v42 = vadd.f32 %v310_v38, %v309_v30  ;;  %v327_v44 = vadd.f32 %v326_v40, %v325_v35 }
  0xa1   :  { %v172_v15 = vpop.f32.mrf.mxu1  ;;  %v312_v46 = vrot.slane %v311_v42, 1 }
  0xa5   :  { %363 = vmatmul.msk.f32.gmra.mxu3 %vm175_vm7, %v123_v47 }
  0xad   :  { %364 = vmatmul.msk.f32.gmra.mxu3 %vm175_vm7, %v124_v48  ;;  %v328_v48 = vrot.slane %v327_v44, 1 }
 0x120   :  { %v205_v55 = vpop.f32.mrf.mxu2  ;;  %v208_v56 = vpop.f32.mrf.mxu3 }
 0x121   :  { %v206_v58 = vadd.f32 %v205_v55, %v163_v49  ;;  %v209_v59 = vadd.f32 %v208_v56, %v166_v53 }
 0x123   :  { %v241_v62 = vadd.f32 %v224_v52, %v206_v58  ;;  %v242_v63 = vadd.f32 %v229_v60, %v209_v59  ;;  %v329_v52 = vadd.f32 %v328_v48, %v327_v44 }
 0x125   :  { %v249_v2 = vmul.f32 0.01, %v241_v62  ;;  %v250_v3 = vmul.f32 0.01, %v242_v63  ;;  %vm245_vm8 = vcmp.ge.f32.partialorder %v241_v62, 0.0  ;;  %vm246_vm9 = vcmp.ge.f32.partialorder %v242_v63, 0.0 }
 0x127   :  { %v253_v11 = vsel %vm245_vm8, %v241_v62, %v249_v2  ;;  %v254_v12 = vsel %vm246_vm9, %v242_v63, %v250_v3 }
 0x128   :  { %v211_v0 = vpop.f32.mrf.mxu3  ;;  %v281_v18 = vmul.f32 %v264_v10, %v253_v11  ;;  %v282_v19 = vmul.f32 %v269_v54, %v254_v12  ;;  %v332_v54 = vstv %s579_s9 }
 0x129   :  { %v212_v5 = vadd.f32 %v211_v0, %v169_v61 }
 0x12a   :  { %v286_v25 = vsel %vm285_vm12, %v281_v18, 0.0  ;;  %v287_v26 = vsel %vm285_vm12, %v282_v19, 0.0 }
 0x12b   :  { %v243_v8 = vadd.f32 %v234_v50, %v212_v5  ;;  %v288_v32 = vadd.f32 %v287_v26, %v286_v25  ;;  %v313_v50 = vadd.f32 %v312_v46, %v311_v42 }
 0x12d   :  { %vm247_vm11 = vcmp.ge.f32.partialorder %v243_v8, 0.0  ;;  %v251_v13 = vmul.f32 0.01, %v243_v8 }
 0x12f   :  { %v255_v16 = vsel %vm247_vm11, %v243_v8, %v251_v13 }
 0x130   :  { %v214_v20 = vpop.f32.mrf.mxu3  ;;  %v283_v23 = vmul.f32 %v274_v57, %v255_v16 }
 0x131   :  { %v215_v21 = vadd.f32 %v214_v20, %v172_v15 }
 0x132   :  { %v289_v29 = vsel %vm285_vm12, %v283_v23, 0.0 }
 0x133   :  { %v244_v4 = vadd.f32 %v239_v51, %v215_v21  ;;  %v290_v36 = vadd.f32 %v289_v29, %v288_v32 }
 0x135   :  { %vm248_vm13 = vcmp.ge.f32.partialorder %v244_v4, 0.0  ;;  %v252_v28 = vmul.f32 0.01, %v244_v4 }
 0x137   :  { %v256_v33 = vsel %vm248_vm13, %v244_v4, %v252_v28 }
 0x138   :  { %v284_v34 = vmul.f32 %v279_v31, %v256_v33 }
 0x13a   :  { %v291_v37 = vsel %vm285_vm12, %v284_v34, 0.0 }
 0x13b   :  { %v292_v39 = vadd.f32 %v291_v37, %v290_v36 }
 0x13d   :  { %v293_v41 = vrot.slane %v292_v39, 4 }
 0x13f   :  { %v294_v43 = vadd.f32 %v293_v41, %v292_v39 }
 0x141   :  { %v295_v45 = vrot.slane %v294_v43, 2 }
 0x143   :  { %v296_v47 = vadd.f32 %v295_v45, %v294_v43 }
 0x145   :  { %v297_v49 = vrot.slane %v296_v47, 1 }
 0x147   :  { %v298_v51 = vadd.f32 %v297_v49, %v296_v47 }
 0x149   :  { %v314_v53 = vadd.f32 %v313_v50, %v298_v51 }
 0x14b   :  { %v330_v55 = vadd.f32 %v329_v52, %v314_v53 }
 0x14d   :  { %v333_v56 = vadd.f32 %v332_v54, %v330_v55 }
 0x14f   :  { %335 = vst.msk [vmem:[#allocation3] sm:$0x1] %vm334_vm14, %v333_v56 }
 0x150   :  { %346 = dma.vmem_to_hbm [thread:$0]  %s342_s21, 16, %s344_s23, [#allocation4]  }
 0x151   :  { %400 = dma.done.wait [#allocation4], 16  }
 0x152   :  { %401 = vsyncadd [#allocation4], 4294967280 }
 0x153   :  { %351 = vsyncpa [#allocation4], 1 }

</bundles_post_ra>
